<compile_context>
chip_gen: v7x
topology: tpu7x:2x2x1
jax: 0.10.0
libtpu: 0.0.40
codegen_flags: <defaults>
</compile_context>

<pallas_src>
import functools

import jax
import jax.numpy as jnp
from jax.experimental import pallas as pl
from jax.experimental.pallas import tpu as pltpu


def _round_up(a: int, b: int) -> int:
    return (a + b - 1) // b * b


def _gap_kernel(x_ref, o_ref, acc_ref, *, inv_hw: float):
    """x_ref: (TILE_NC, TILE_HW); o_ref: (TILE_NC, 1); acc_ref: (TILE_NC, 128) f32."""
    k = pl.program_id(1)

    @pl.when(k == 0)
    def _init():
        acc_ref[...] = jnp.zeros_like(acc_ref)

    # f32 accumulation (matches torch.mean numerics; required upcast for bf16
    # inputs on v5e anyway).
    x = x_ref[...].astype(jnp.float32)          # (tile_nc, tile_hw)
    tile_hw = x.shape[1]                        # static, multiple of 128

    # Per-lane partial sums: static, lane-aligned 128-wide slices added on the
    # VPU (cheap filler under the DMA).  No cross-lane work here.
    partial = x[:, 0:128]
    for j in range(1, tile_hw // 128):
        partial = partial + x[:, j * 128:(j + 1) * 128]
    acc_ref[...] += partial

    @pl.when(k == pl.num_programs(1) - 1)
    def _finalize():
        # Single cross-lane (XLU) reduce per output tile, then scale and cast.
        total = jnp.sum(acc_ref[...], axis=1, keepdims=True)   # (tile_nc, 1)
        o_ref[...] = (total * inv_hw).astype(o_ref.dtype)


def global_avg_pool(x, *, tile_nc: int = 256, tile_hw: int = 2048):
    """x: (N, C, H, W) -> (N, C), mean over the last two (spatial) dims."""
    n, c, h, w = x.shape
    nc, hw = n * c, h * w
    inv_hw = 1.0 / float(hw)

    # Free reshape: NCHW is contiguous over (H, W).
    x2 = x.reshape(nc, hw)

    # Tile sizes: multiples of (8, 128), clamped to the padded problem size.
    tile_nc = min(_round_up(tile_nc, 8), _round_up(nc, 8))
    tile_hw = min(_round_up(tile_hw, 128), _round_up(hw, 128))

    nc_pad = _round_up(nc, tile_nc)
    hw_pad = _round_up(hw, tile_hw)
    if (nc_pad, hw_pad) != (nc, hw):
        # Zero padding keeps the sum exact; padded NC rows are sliced off.
        x2 = jnp.pad(x2, ((0, nc_pad - nc), (0, hw_pad - hw)))

    grid = (nc_pad // tile_nc, hw_pad // tile_hw)
    itemsize = x.dtype.itemsize

    kernel = functools.partial(_gap_kernel, inv_hw=inv_hw)

    out = pl.pallas_call(
        kernel,
        out_shape=jax.ShapeDtypeStruct((nc_pad, 1), x.dtype),
        grid_spec=pltpu.PrefetchScalarGridSpec(
            num_scalar_prefetch=0,
            grid=grid,
            in_specs=[pl.BlockSpec((tile_nc, tile_hw), lambda i, k: (i, k))],
            # Same output block across the reduction axis -> resident accumulator.
            out_specs=pl.BlockSpec((tile_nc, 1), lambda i, k: (i, 0)),
            scratch_shapes=[pltpu.VMEM((tile_nc, 128), jnp.float32)],
        ),
        compiler_params=pltpu.CompilerParams(
            dimension_semantics=("parallel", "arbitrary"),
        ),
        cost_estimate=pl.CostEstimate(
            flops=nc_pad * hw_pad,
            transcendentals=0,
            bytes_accessed=nc_pad * hw_pad * itemsize + nc_pad * itemsize,
        ),
    )(x2)

    return out[:nc, 0].reshape(n, c)


if __name__ == "__main__":
    key = jax.random.PRNGKey(0)
    k1, k2, k3 = jax.random.split(key, 3)

    # 1) Shape implied by the module spec (batch=2, channels=4, spatial=16).
    x1 = jax.random.normal(k1, (2, 4, 16, 16), dtype=jnp.float32)
    out1 = jax.block_until_ready(global_avg_pool(x1))
    ref1 = jnp.mean(x1, axis=(-2, -1))
    assert out1.shape == (2, 4), out1.shape
    assert jnp.allclose(out1, ref1, atol=1e-5, rtol=1e-5)

    # 2) Multi-step reduction grid (H*W = 1536, tile_hw = 512 -> 3 grid steps)
    #    to exercise the accumulator init / accumulate / finalize path.
    x2 = jax.random.normal(k2, (2, 4, 32, 48), dtype=jnp.float32)
    out2 = jax.block_until_ready(global_avg_pool(x2, tile_nc=8, tile_hw=512))
    ref2 = jnp.mean(x2, axis=(-2, -1))
    assert out2.shape == (2, 4), out2.shape
    assert jnp.allclose(out2, ref2, atol=1e-5, rtol=1e-5)

    # 3) Ragged shape to exercise the zero-padding path (N*C=3, H*W=100).
    x3 = jax.random.normal(k3, (1, 3, 10, 10), dtype=jnp.float32)
    out3 = jax.block_until_ready(global_avg_pool(x3))
    ref3 = jnp.mean(x3, axis=(-2, -1))
    assert out3.shape == (1, 3), out3.shape
    assert jnp.allclose(out3, ref3, atol=1e-5, rtol=1e-5)

    print("KERNEL_OK")
</pallas_src>

<mosaic_0001>
module attributes {stable_mosaic.version = 11 : i64} {
  func.func @_gap_kernel(%arg0: i32, %arg1: i32, %arg2: memref<8x256xf32, #tpu.memory_space<vmem>>, %arg3: memref<8x1xf32, #tpu.memory_space<vmem>>, %arg4: memref<8x128xf32, #tpu.memory_space<vmem>>) attributes {dimension_semantics = [#tpu.dimension_semantics<parallel>, #tpu.dimension_semantics<arbitrary>], iteration_bounds = array<i64: 1, 1>, scalar_prefetch = 0 : i64, scratch_operands = 1 : i64, tpu.core_type = #tpu.core_type<tc>, window_params = [{transform_indices = @transform_0, window_bounds = array<i64: 8, 256>}, {transform_indices = @transform_1, window_bounds = array<i64: 8, 1>}]} {
    %c0_i32 = arith.constant 0 : i32
    %0 = arith.cmpi eq, %arg1, %c0_i32 : i32
    %1 = arith.extui %0 : i1 to i32
    %c0_i32_0 = arith.constant 0 : i32
    %2 = arith.cmpi ne, %1, %c0_i32_0 : i32
    scf.if %2 {
      %cst = arith.constant 0.000000e+00 : f32
      %13 = vector.broadcast %cst : f32 to vector<8x128xf32>
      %c0_8 = arith.constant 0 : index
      %c0_9 = arith.constant 0 : index
      %14 = vector.load %arg4[%c0_8, %c0_9] : memref<8x128xf32, #tpu.memory_space<vmem>>, vector<8x128xf32>
      tpu.vector_store %arg4[%c0_8, %c0_9], %13 {strides = array<i32>} : memref<8x128xf32, #tpu.memory_space<vmem>>, vector<8x128xf32>,
    } else {
    }
    %c0 = arith.constant 0 : index
    %c0_1 = arith.constant 0 : index
    %3 = vector.load %arg2[%c0, %c0_1] : memref<8x256xf32, #tpu.memory_space<vmem>>, vector<8x256xf32>
    %4 = vector.extract_strided_slice %3 {offsets = [0, 0], sizes = [8, 128], strides = [1, 1]} : vector<8x256xf32> to vector<8x128xf32>
    %5 = vector.extract_strided_slice %3 {offsets = [0, 128], sizes = [8, 128], strides = [1, 1]} : vector<8x256xf32> to vector<8x128xf32>
    %6 = arith.addf %4, %5 : vector<8x128xf32>
    %c0_2 = arith.constant 0 : index
    %c0_3 = arith.constant 0 : index
    %7 = vector.load %arg4[%c0_2, %c0_3] : memref<8x128xf32, #tpu.memory_space<vmem>>, vector<8x128xf32>
    %8 = arith.addf %7, %6 : vector<8x128xf32>
    %c0_4 = arith.constant 0 : index
    %c0_5 = arith.constant 0 : index
    %9 = vector.load %arg4[%c0_4, %c0_5] : memref<8x128xf32, #tpu.memory_space<vmem>>, vector<8x128xf32>
    tpu.vector_store %arg4[%c0_4, %c0_5], %8 {strides = array<i32>} : memref<8x128xf32, #tpu.memory_space<vmem>>, vector<8x128xf32>,
    %c0_i32_6 = arith.constant 0 : i32
    %10 = arith.cmpi eq, %arg1, %c0_i32_6 : i32
    %11 = arith.extui %10 : i1 to i32
    %c0_i32_7 = arith.constant 0 : i32
    %12 = arith.cmpi ne, %11, %c0_i32_7 : i32
    scf.if %12 {
      %c0_8 = arith.constant 0 : index
      %c0_9 = arith.constant 0 : index
      %13 = vector.load %arg4[%c0_8, %c0_9] : memref<8x128xf32, #tpu.memory_space<vmem>>, vector<8x128xf32>
      %cst = arith.constant dense<0.000000e+00> : vector<8xf32>
      %14 = vector.multi_reduction <add>, %13, %cst [1] : vector<8x128xf32> to vector<8xf32>
      %15 = vector.shape_cast %14 : vector<8xf32> to vector<8x1xf32>
      %cst_10 = arith.constant 3.906250e-03 : f32
      %16 = vector.broadcast %cst_10 : f32 to vector<8x1xf32>
      %17 = arith.mulf %15, %16 : vector<8x1xf32>
      %c0_11 = arith.constant 0 : index
      %c0_12 = arith.constant 0 : index
      %18 = vector.load %arg3[%c0_11, %c0_12] : memref<8x1xf32, #tpu.memory_space<vmem>>, vector<8x1xf32>
      tpu.vector_store %arg3[%c0_11, %c0_12], %17 {strides = array<i32>} : memref<8x1xf32, #tpu.memory_space<vmem>>, vector<8x1xf32>,
    } else {
    }
    return
  }
  func.func @transform_0(%arg0: i32, %arg1: i32) -> (i32, i32) {
    %c0_i32 = arith.constant 0 : i32
    return %arg0, %arg1 : i32, i32
  }
  func.func @transform_1(%arg0: i32, %arg1: i32) -> (i32, i32) {
    %c0_i32 = arith.constant 0 : i32
    %c0_i32_0 = arith.constant 0 : i32
    return %arg0, %c0_i32 : i32, i32
  }
}

</mosaic_0001>

<bundles_post_ra>
// kernel: tpu_custom_call.1
= control target key start
LH: loop header
LB: loop body
LE: loop exit
PB: predicated region body
PF: predicated region fallthrough
CT: control target
= control target key end

     0   :  { %6 = vsyncpa [#allocation4], 0  ;;  %s70_s6 = smov [#allocation3]   ;;  %s96_s0 = inlined_call_operand.hbm [shape: f32[8,256], index: 0, kind: input, shape index: {}]   ;;  %s97_s1 = inlined_call_operand.vmem [shape: f32[8,1], index: 1, kind: output, shape index: {}]  }
   0x1   :  { %s13_s7 = sshll.u32 %s70_s6, 4  ;;  %s46_s10 = scalar_lea.hbm %s96_s0, 256  ;;  %s14_s7 = int_to_ptr.vmem [resolvable:$true] %s13_s7 }
   0x2   :  { %p47_p0 = scmp.ne.s32.totalorder %s96_s0, %s46_s10  ;;  %p50_p1 = scmp.lt.u32.totalorder %s46_s10, %s96_s0 }
   0x4   :  { %p52_p2 = pnand %p50_p1, %p47_p0 }
   0x6   :  { %55 = shalt.err (!%p52_p2)
}
   0x7   :  { %s56_s15 = scalar_lea.vmem %s14_s7, 256  ;;  %p61_p4 = scmp.lt.s32.totalorder %s14_s7, %s14_s7 }
   0x8   :  { %p57_p3 = scmp.ne.s32.totalorder %s14_s7, %s56_s15  ;;  %p62_p5 = scmp.lt.s32.totalorder %s56_s15, %s56_s15 }
   0xa   :  { %p63_p6 = por %p62_p5, %p61_p4 }
   0xc   :  { %p64_p7 = pnand %p63_p6, %p57_p3 }
   0xe   :  { %67 = shalt.err (!%p64_p7)
}
   0xf   :  { %16 = dma.hbm_to_vmem [thread:$0]  %s96_s0, 256, %s14_s7, [#allocation4]  }
  0x10   :  { %68 = dma.done.wait [#allocation4], 256  }
  0x11   :  { %69 = vsyncadd [#allocation4], 4294967040  ;;  %v25_v0 = vld [vmem:[#allocation3] sm:$0xff]  ;;  %v26_v1 = vld [vmem:[#allocation3 + $0x8] sm:$0xff]  ;;  %vm38_vm0 = vcmask 7168  }
  0x12   :  { %v27_v2 = vadd.f32 %v26_v1, %v25_v0 }
  0x14   :  { %35 = vadd.xlane.f32.xlu0 %v27_v2 }
  0xa1   :  { %v36_v3 = vpop.xlane.xlu0 %35 }
  0xa2   :  { %v37_v4 = vmul.f32 0.00390625, %v36_v3 }
  0xa4   :  { %39 = vst.msk [vmem:[%s97_s1] sm:$0xff] %vm38_vm0, %v37_v4 }
  0xa5   :  { %44 = vsyncpa [#allocation4], 1 }

</bundles_post_ra>
